<compile_context>
chip_gen: v5e
topology: v5e:2x2
jax: 0.10.0
libtpu: 0.0.40
codegen_flags: <defaults>
</compile_context>

<pallas_src>
import functools
import numpy as np
import jax
import jax.numpy as jnp
from jax import lax
from jax.experimental import pallas as pl
from jax.experimental.pallas import tpu as pltpu

_MB = 1024 * 1024


def _rup(x, m):
    return ((x + m - 1) // m) * m


def _vmem_capacity_bytes():
    """Per-core VMEM capacity; conservative fallback if the query is unavailable."""
    try:
        info = pltpu.get_tpu_info()
        for name in ("vmem_capacity_bytes", "vmem_bytes", "vmem_size_bytes"):
            v = getattr(info, name, None)
            if v:
                return int(v)
    except Exception:
        pass
    return 64 * _MB  # v7x per-TensorCore size (smallest of v5e/v6e/v7x)


# -----------------------------------------------------------------------------
# Kernel 1: sim[b] = h_s[b] @ h_t[b]^T   (bf16 MXU inputs, f32 accumulation)
# -----------------------------------------------------------------------------
def _sim_kernel(hs_ref, ht_ref, out_ref):
    out_ref[...] = jnp.einsum("bsc,btc->bst", hs_ref[...], ht_ref[...],
                              preferred_element_type=jnp.float32)


def _pick_tile(n, align, cap):
    """Largest divisor of n that is a multiple of `align` and <= cap, else n (full dim)."""
    c = (min(n, cap) // align) * align
    while c >= align:
        if n % c == 0:
            return c
        c -= align
    return n


def sim_matrix_pallas(h_s, h_t, matmul_dtype=jnp.bfloat16):
    B, N_s, C = h_s.shape
    _, N_t, _ = h_t.shape
    cap = _vmem_capacity_bytes()

    ts = _pick_tile(N_s, 8, 512)      # sublane dim of the output tile
    tt = _pick_tile(N_t, 128, 512)    # lane dim of the output tile
    in_b = jnp.dtype(matmul_dtype).itemsize
    per_batch = 2 * (ts * C * in_b + tt * C * in_b + ts * tt * 4)   # double-buffered
    budget = min(cap // 4, 32 * _MB)  # ~16 MiB on v7x, 32 MiB on v5e/v6e
    tb = 1
    for c in range(1, B + 1):
        if B % c == 0 and c * per_batch <= budget:
            tb = c
    vmem_limit = int(min(cap - 8 * _MB, max(32 * _MB, 2 * tb * per_batch + 8 * _MB)))

    return pl.pallas_call(
        _sim_kernel,
        out_shape=jax.ShapeDtypeStruct((B, N_s, N_t), jnp.float32),
        grid_spec=pltpu.PrefetchScalarGridSpec(
            num_scalar_prefetch=0,
            grid=(B // tb, N_s // ts, N_t // tt),
            in_specs=[pl.BlockSpec((tb, ts, C), lambda b, s, t: (b, s, 0)),
                      pl.BlockSpec((tb, tt, C), lambda b, s, t: (b, t, 0))],
            out_specs=pl.BlockSpec((tb, ts, tt), lambda b, s, t: (b, s, t))),
        compiler_params=pltpu.CompilerParams(
            dimension_semantics=("parallel", "parallel", "parallel"),
            vmem_limit_bytes=vmem_limit),
    )(h_s.astype(matmul_dtype), h_t.astype(matmul_dtype))


# -----------------------------------------------------------------------------
# Kernel 2: one grid step handles source node i (axis 0) and a tile of TJ
# target nodes j (axis 1).  All slicing is done by BlockSpec index_maps.
# Temporaries are laid out [P, B, J, Q] (P = N_s, Q = N_t): column sums reduce
# over the leading dim (cheap), softmax/argmax reduce over lanes.
# Padded rows/cols are exact zeros, so results match the compacted PyTorch code.
# -----------------------------------------------------------------------------
def _update_kernel(adj_si_ref, adj_t_ref, simT_ref, sim_i_ref, su_ref,
                   smask_ref, tmask_ref, su_out_ref, sim_out_ref,
                   *, num_steps, tau):
    # adj_si_ref : [P, B]       adjacency row of source node i (wrapper-transposed)
    # adj_t_ref  : [B, J, Q]    adjacency rows of the target-node tile
    # simT_ref   : [P, B, Q]    full similarity matrix (resident across the grid)
    # sim_i_ref  : [B, J]       sim[i, :, j-tile]   (for the fused sim update)
    # su_ref     : [B, J]       previous sim_update[i, :, j-tile]
    # smask_ref  : [B, 1]       source-node validity of node i (f32)
    # tmask_ref  : [B, J]       target-node validity of the tile (f32)
    row = adj_si_ref[...] != 0.0                          # [P, B]
    col = adj_t_ref[...] != 0.0                           # [B, J, Q]
    mask = row[:, :, None, None] & col[None, :, :, :]     # [P, B, J, Q]
    s_b = simT_ref[...][:, :, None, :]                    # [P, B, 1, Q]

    # Masked softmax over q, then / tau.  Masked lanes of valid rows underflow
    # exp() to exactly 0 in f32; the denominator is >= 1 (exp(0) of the row max)
    # so there is no 0/0.  Fully masked rows are zeroed by the final select.
    logits = jnp.where(mask, s_b, -1e30)
    p = jnp.exp(logits - jnp.max(logits, axis=-1, keepdims=True))
    denom = jnp.sum(p, axis=-1, keepdims=True)            # [P, B, J, 1]
    s = jnp.where(mask, p * pl.reciprocal(denom * tau, approx=True), 0.0)

    # Sinkhorn.  approx reciprocals only where they rescale a whole row
    # uniformly (cannot perturb the per-row argmax); the column normalisation
    # stays exact so greedy-assignment ties behave like the reference.
    def _sinkhorn_step(_, s):
        col_sum = jnp.sum(s, axis=0, keepdims=True)       # over p -> [1, B, J, Q]
        s = s * pl.reciprocal(col_sum + 1e-8)
        row_sum = jnp.sum(s, axis=-1, keepdims=True)      # over q -> [P, B, J, 1]
        s = s * pl.reciprocal(row_sum + 1e-8, approx=True)
        return s

    s = lax.fori_loop(0, num_steps, _sinkhorn_step, s, unroll=True)

    # first-occurrence argmax over q (== torch .max(dim=-1).indices), greedy cost.
    q = s.shape[-1]
    q_ids = lax.broadcasted_iota(jnp.int32, (1, 1, 1, q), 3)
    s_max = jnp.max(s, axis=-1, keepdims=True)
    first_idx = jnp.min(jnp.where(s == s_max, q_ids, q), axis=-1, keepdims=True)
    pick = (q_ids == first_idx) & mask                    # == one_hot(argmax) & mask
    cost = jnp.sum(jnp.where(pick, s_b, 0.0), axis=(0, 3))   # [B, J]

    deg_i = jnp.sum(row.astype(jnp.float32), axis=0)      # [B]
    deg_j = jnp.sum(col.astype(jnp.float32), axis=-1)     # [B, J]
    m = jnp.maximum(deg_i[:, None], deg_j)                # [B, J]

    su = su_ref[...]                                      # [B, J]
    su_new = su + (cost - m * su) / (1.0 + m)
    su_out_ref[...] = su_new

    # Fused epilogue: sim_matrix[S_mask] += sim_update[S_mask]
    keep = (smask_ref[...] * tmask_ref[...]) > 0.0        # [B, J]
    sim_i = sim_i_ref[...]
    sim_out_ref[...] = jnp.where(keep, sim_i + su_new, sim_i)


def _update_vmem_plan(B, N_s, N_t):
    """Pick the target-node tile (tj) and a per-generation VMEM limit."""
    cap = _vmem_capacity_bytes()
    temp_budget = min(cap // 2, 64 * _MB)   # ~32 MiB on v7x, 64 MiB on v5e/v6e
    n_live = 8                              # live [P,B,J,Q] f32-equivalent temporaries

    def temps(tj):
        return n_live * N_s * B * _rup(tj, 8) * _rup(N_t, 128) * 4

    # Legal, lane-aligned tiles: tj == N_t (full) or a multiple of 128 dividing N_t.
    cands = [N_t] + [c for c in range((N_t // 128) * 128, 0, -128) if N_t % c == 0]
    tj = next((c for c in cands if temps(c) <= temp_budget), cands[-1])
    # TODO(synk): for very large B * N_s * N_t the 4-D temporaries need an extra
    #             batch tile as well; out of scope for this workload.

    lane_nt = _rup(N_t, 128)
    lane_tj = _rup(tj, 128)
    sub_b = _rup(B, 8)
    resident = 2 * N_s * sub_b * lane_nt * 4                      # resident sim (+slack)
    pipelined = 2 * (B * _rup(tj, 8) * lane_nt * 4                # adj_t tile
                     + 5 * sub_b * lane_tj * 4                    # sim_i, su, tmask, 2 outs
                     + sub_b * 128 * 4                            # smask
                     + _rup(N_s, 8) * _rup(B, 128) * 4)           # adj_s row of i
    vmem_limit = resident + pipelined + temps(tj) + 8 * _MB
    vmem_limit = int(min(cap - 8 * _MB, max(32 * _MB, vmem_limit)))
    return tj, vmem_limit


def sim_update_pallas(adj_si, adj_t, sim_T, su_T, smask_i, tmask_f, num_steps, tau):
    """One outer iteration.  All arrays except adj_t are source-node major:

    adj_si  : [N_s, N_s, B]   adj_s transposed to (i, p, b)
    adj_t   : [B, N_t, N_t]
    sim_T   : [N_s, B, N_t]   similarity matrix, (p, b, q) layout
    su_T    : [N_s, B, N_t]   running sim_update, same layout
    smask_i : [N_s, B, 1]     f32 source-node validity
    tmask_f : [B, N_t]        f32 target-node validity
    Returns (new su_T, new sim_T) in the same layout.
    """
    N_s, B, N_t = sim_T.shape
    tj, vmem_limit = _update_vmem_plan(B, N_s, N_t)
    kernel = functools.partial(_update_kernel, num_steps=num_steps, tau=tau)

    su_new, sim_new = pl.pallas_call(
        kernel,
        out_shape=(jax.ShapeDtypeStruct((N_s, B, N_t), jnp.float32),
                   jax.ShapeDtypeStruct((N_s, B, N_t), jnp.float32)),
        grid_spec=pltpu.PrefetchScalarGridSpec(
            num_scalar_prefetch=0,
            grid=(N_s, N_t // tj),
            in_specs=[
                pl.BlockSpec((None, N_s, B), lambda i, j: (i, 0, 0)),   # adj row of i
                pl.BlockSpec((B, tj, N_t), lambda i, j: (0, j, 0)),     # adj_t tile
                pl.BlockSpec((N_s, B, N_t), lambda i, j: (0, 0, 0)),    # sim (resident)
                pl.BlockSpec((None, B, tj), lambda i, j: (i, 0, j)),    # sim[i, :, tile]
                pl.BlockSpec((None, B, tj), lambda i, j: (i, 0, j)),    # su[i, :, tile]
                pl.BlockSpec((None, B, 1), lambda i, j: (i, 0, 0)),     # s_mask[i]
                pl.BlockSpec((B, tj), lambda i, j: (0, j)),             # t_mask tile
            ],
            out_specs=(
                pl.BlockSpec((None, B, tj), lambda i, j: (i, 0, j)),    # new sim_update
                pl.BlockSpec((None, B, tj), lambda i, j: (i, 0, j)),    # new sim
            )),
        compiler_params=pltpu.CompilerParams(
            dimension_semantics=("parallel", "arbitrary"),
            vmem_limit_bytes=vmem_limit),
    )(adj_si, adj_t, sim_T, sim_T, su_T, smask_i, tmask_f)
    return su_new, sim_new


# -----------------------------------------------------------------------------
# Plain-JAX glue: to_dense_batch / to_dense_adj (data-dependent scatters)
# -----------------------------------------------------------------------------
def to_dense_batch_jax(x, batch, B, N):
    total = x.shape[0]
    counts = jnp.bincount(batch, length=B)
    starts = jnp.concatenate([jnp.zeros((1,), counts.dtype), jnp.cumsum(counts)[:-1]])
    pos = jnp.arange(total) - starts[batch]
    dense = jnp.zeros((B, N) + x.shape[1:], x.dtype).at[batch, pos].set(x)
    mask = jnp.zeros((B, N), dtype=bool).at[batch, pos].set(True)
    return dense, mask, pos


def to_dense_adj_jax(edge_index, batch, pos, B, N):
    src, dst = edge_index[0], edge_index[1]
    b = batch[src]
    return jnp.zeros((B, N, N), jnp.float32).at[b, pos[src], pos[dst]].add(1.0)


# -----------------------------------------------------------------------------
# MainModel.forward (include_gnn=False, bypass=False)
# -----------------------------------------------------------------------------
def main_model_forward(x_s, edge_index_s, batch_s, x_t, edge_index_t, batch_t,
                       *, num_steps=5, tau=0.1, num_iter=1, B, N_s, N_t,
                       matmul_dtype=jnp.bfloat16):
    # TODO(synk): psi_1 (external GNN passed to __init__) is not replicated;
    #             this path corresponds to include_gnn=False (h = x).
    h_s, s_mask, pos_s = to_dense_batch_jax(x_s, batch_s, B, N_s)
    h_t, t_mask, pos_t = to_dense_batch_jax(x_t, batch_t, B, N_t)
    adj_s = to_dense_adj_jax(edge_index_s, batch_s, pos_s, B, N_s)
    adj_t = to_dense_adj_jax(edge_index_t, batch_t, pos_t, B, N_t)

    sim = sim_matrix_pallas(h_s, h_t, matmul_dtype)          # [B, N_s, N_t] f32

    # Source-node-major layout for the whole update loop: per-i blocks are
    # leading-dim slices, no transposes inside the num_iter loop, and the fused
    # kernel emits both the new sim_update and the new sim in this layout.
    sim_T = jnp.transpose(sim, (1, 0, 2))                    # [N_s, B, N_t]
    adj_si = jnp.transpose(adj_s, (1, 2, 0))                 # [N_s(i), N_s(p), B]
    smask_i = jnp.transpose(s_mask, (1, 0))[:, :, None].astype(jnp.float32)
    tmask_f = t_mask.astype(jnp.float32)
    su_T = jnp.zeros((N_s, B, N_t), jnp.float32)
    for _ in range(num_iter):
        su_T, sim_T = sim_update_pallas(adj_si, adj_t, sim_T, su_T,
                                        smask_i, tmask_f, num_steps, tau)

    # sim_matrix[s_mask].masked_fill(~sim_t_mask, 0)
    row_idx = pos_s * B + batch_s
    out = sim_T.reshape(N_s * B, N_t)[row_idx]               # [total_s, N_t]
    counts_s = jnp.bincount(batch_s, length=B)
    sim_t_mask = jnp.repeat(t_mask, counts_s, axis=0,
                            total_repeat_length=x_s.shape[0])
    return jnp.where(sim_t_mask, out, 0.0)


# -----------------------------------------------------------------------------
# Pure-JAX reference (same math, fully vectorized, no Pallas) for validation.
# It mirrors the bf16 MXU input rounding so the comparison isolates the Pallas
# implementation (pass matmul_dtype=jnp.float32 for strict f32 parity).
# -----------------------------------------------------------------------------
def _ref_forward(x_s, edge_index_s, batch_s, x_t, edge_index_t, batch_t,
                 *, num_steps, tau, num_iter, B, N_s, N_t,
                 matmul_dtype=jnp.bfloat16):
    h_s, s_mask, pos_s = to_dense_batch_jax(x_s, batch_s, B, N_s)
    h_t, t_mask, pos_t = to_dense_batch_jax(x_t, batch_t, B, N_t)
    adj_s = to_dense_adj_jax(edge_index_s, batch_s, pos_s, B, N_s)
    adj_t = to_dense_adj_jax(edge_index_t, batch_t, pos_t, B, N_t)

    sim = jnp.einsum("bsc,btc->bst", h_s.astype(matmul_dtype),
                     h_t.astype(matmul_dtype),
                     preferred_element_type=jnp.float32)
    S_mask = s_mask[:, :, None] & t_mask[:, None, :]
    sim_update = jnp.zeros((B, N_s, N_t), jnp.float32)
    for _ in range(num_iter):
        row_mask = adj_s != 0.0                          # [B, N_s(i), N_s(p)]
        col_mask = adj_t != 0.0                          # [B, N_t(j), N_t(q)]
        mask = row_mask[:, :, None, :, None] & col_mask[:, None, :, None, :]
        s_b = sim[:, None, None, :, :]
        s_hat = jnp.where(mask, s_b, 0.0)
        logits = jnp.where(mask, s_b, -1e30)
        p = jnp.where(mask, jnp.exp(logits - jnp.max(logits, -1, keepdims=True)), 0.0)
        s = jnp.where(mask, p / jnp.sum(p, -1, keepdims=True), 0.0) / tau
        for _ in range(num_steps):
            s = s / (jnp.sum(s, -2, keepdims=True) + 1e-8)
            s = s / (jnp.sum(s, -1, keepdims=True) + 1e-8)
        q_ids = jnp.arange(N_t)
        is_max = s == jnp.max(s, -1, keepdims=True)
        first_idx = jnp.min(jnp.where(is_max, q_ids, N_t), -1, keepdims=True)
        max_mask = q_ids == first_idx
        cost = jnp.sum(jnp.where(max_mask, s_hat, 0.0), axis=(-1, -2))    # [B,N_s,N_t]
        deg_i = jnp.sum(row_mask.astype(jnp.float32), -1)                 # [B,N_s]
        deg_j = jnp.sum(col_mask.astype(jnp.float32), -1)                 # [B,N_t]
        m = jnp.maximum(deg_i[:, :, None], deg_j[:, None, :])
        sim_update = sim_update + (cost - m * sim_update) / (1.0 + m)
        sim = jnp.where(S_mask, sim + sim_update, sim)

    row_idx = batch_s * N_s + pos_s
    out = sim.reshape(B * N_s, N_t)[row_idx]
    counts_s = jnp.bincount(batch_s, length=B)
    sim_t_mask = jnp.repeat(t_mask, counts_s, axis=0,
                            total_repeat_length=x_s.shape[0])
    return jnp.where(sim_t_mask, out, 0.0)


# -----------------------------------------------------------------------------
def _chain_edges(sizes):
    edges, off = [], 0
    for n in sizes:
        for a in range(n - 1):
            edges.append((off + a, off + a + 1))
            edges.append((off + a + 1, off + a))
        off += n
    return jnp.asarray(edges, jnp.int32).T                # [2, E]


if __name__ == "__main__":
    key = jax.random.PRNGKey(0)
    C = 16
    src_sizes, tgt_sizes = [5, 8], [6, 8]
    B = 2
    N_s, N_t = max(src_sizes), max(tgt_sizes)
    total_s, total_t = sum(src_sizes), sum(tgt_sizes)

    k1, k2 = jax.random.split(key, 2)
    x_s = jax.random.normal(k1, (total_s, C), jnp.float32)
    x_t = jax.random.normal(k2, (total_t, C), jnp.float32)
    batch_s = jnp.asarray(sum(([b] * n for b, n in enumerate(src_sizes)), []), jnp.int32)
    batch_t = jnp.asarray(sum(([b] * n for b, n in enumerate(tgt_sizes)), []), jnp.int32)
    edge_index_s = _chain_edges(src_sizes)
    edge_index_t = _chain_edges(tgt_sizes)
    # TODO(synk): self.mlp (Linear(1,16)/ReLU/Linear(16,1)) exists in __init__ but
    #             is never used in forward(); not instantiated here.

    out = main_model_forward(x_s, edge_index_s, batch_s, x_t, edge_index_t, batch_t,
                             num_steps=5, tau=0.1, num_iter=1,
                             B=B, N_s=N_s, N_t=N_t)
    out = jax.block_until_ready(out)

    ref = _ref_forward(x_s, edge_index_s, batch_s, x_t, edge_index_t, batch_t,
                       num_steps=5, tau=0.1, num_iter=1, B=B, N_s=N_s, N_t=N_t)
    assert out.shape == (total_s, N_t)
    assert bool(jnp.all(jnp.isfinite(out)))
    np.testing.assert_allclose(np.asarray(out), np.asarray(ref), rtol=2e-3, atol=2e-3)
    print("KERNEL_OK")
</pallas_src>

<mosaic_0001>
module attributes {stable_mosaic.version = 11 : i64} {
  func.func @_sim_kernel(%arg0: i32, %arg1: i32, %arg2: i32, %arg3: memref<2x8x16xbf16, #tpu.memory_space<vmem>>, %arg4: memref<2x8x16xbf16, #tpu.memory_space<vmem>>, %arg5: memref<2x8x8xf32, #tpu.memory_space<vmem>>) attributes {dimension_semantics = [#tpu.dimension_semantics<parallel>, #tpu.dimension_semantics<parallel>, #tpu.dimension_semantics<parallel>], iteration_bounds = array<i64: 1, 1, 1>, scalar_prefetch = 0 : i64, scratch_operands = 0 : i64, tpu.core_type = #tpu.core_type<tc>, window_params = [{transform_indices = @transform_0, window_bounds = array<i64: 2, 8, 16>}, {transform_indices = @transform_1, window_bounds = array<i64: 2, 8, 16>}, {transform_indices = @transform_2, window_bounds = array<i64: 2, 8, 8>}]} {
    %c0 = arith.constant 0 : index
    %c0_0 = arith.constant 0 : index
    %c0_1 = arith.constant 0 : index
    %0 = vector.load %arg3[%c0, %c0_0, %c0_1] : memref<2x8x16xbf16, #tpu.memory_space<vmem>>, vector<2x8x16xbf16>
    %c0_2 = arith.constant 0 : index
    %c0_3 = arith.constant 0 : index
    %c0_4 = arith.constant 0 : index
    %1 = vector.load %arg4[%c0_2, %c0_3, %c0_4] : memref<2x8x16xbf16, #tpu.memory_space<vmem>>, vector<2x8x16xbf16>
    "tpu.trace_start"() <{level = 10 : i32, message = "bsc,btc->bst"}> : () -> ()
    %cst = arith.constant dense<0.000000e+00> : vector<2x8x8xf32>
    %2 = tpu.matmul %0, %1, %cst {dimension_numbers = #tpu.dot_dimension_numbers<[2], [2], [1], [1], [0, 0, 0, 1, 1, 1], [0], [0]>} : vector<2x8x16xbf16>, vector<2x8x16xbf16>, vector<2x8x8xf32> -> vector<2x8x8xf32>
    "tpu.trace_stop"() : () -> ()
    %c0_5 = arith.constant 0 : index
    %c0_6 = arith.constant 0 : index
    %c0_7 = arith.constant 0 : index
    %3 = vector.load %arg5[%c0_5, %c0_6, %c0_7] : memref<2x8x8xf32, #tpu.memory_space<vmem>>, vector<2x8x8xf32>
    tpu.vector_store %arg5[%c0_5, %c0_6, %c0_7], %2 {strides = array<i32>} : memref<2x8x8xf32, #tpu.memory_space<vmem>>, vector<2x8x8xf32>,
    return
  }
  func.func @transform_0(%arg0: i32, %arg1: i32, %arg2: i32) -> (i32, i32, i32) {
    %c0_i32 = arith.constant 0 : i32
    %c0_i32_0 = arith.constant 0 : i32
    return %arg0, %arg1, %c0_i32 : i32, i32, i32
  }
  func.func @transform_1(%arg0: i32, %arg1: i32, %arg2: i32) -> (i32, i32, i32) {
    %c0_i32 = arith.constant 0 : i32
    %c0_i32_0 = arith.constant 0 : i32
    return %arg0, %arg2, %c0_i32 : i32, i32, i32
  }
  func.func @transform_2(%arg0: i32, %arg1: i32, %arg2: i32) -> (i32, i32, i32) {
    %c0_i32 = arith.constant 0 : i32
    return %arg0, %arg1, %arg2 : i32, i32, i32
  }
}

</mosaic_0001>

<bundles_post_ra>
// kernel: tpu_custom_call.1
= control target key start
LH: loop header
LB: loop body
LE: loop exit
PB: predicated region body
PF: predicated region fallthrough
CT: control target
= control target key end

     0   :  { %7 = vsyncpa [#allocation3], 0  ;;  %s229_s0 = inlined_call_operand.hbm [shape: bf16[2,8,16], index: 0, kind: input, shape index: {}]   ;;  %s230_s1 = inlined_call_operand.hbm [shape: bf16[2,8,16], index: 1, kind: input, shape index: {}]   ;;  %s231_s2 = inlined_call_operand.hbm [shape: f32[2,8,8], index: 2, kind: output, shape index: {}]  }
   0x1   :  { %8 = vsyncpa [#allocation6], 0 }
   0x2   :  { %9 = vsyncpa [#allocation4], 0  ;;  %s14_s11 = sshll.u32 %s229_s0, 4  ;;  %s198_s12 = smov [#allocation2]   ;;  %s15_s11 = int_to_ptr.hbm [resolvable:$true] %s14_s11 }
   0x3   :  { %s16_s13 = sshll.u32 %s198_s12, 4  ;;  %s27_s16 = sshll.u32 %s230_s1, 4  ;;  %s17_s13 = int_to_ptr.vmem [resolvable:$true] %s16_s13  ;;  %s28_s16 = int_to_ptr.hbm [resolvable:$true] %s27_s16 }
   0x4   :  { %s199_s17 = smov 64   ;;  %s200_s18 = smov 4  }
   0x5   :  { %22 = dma.hbm_to_vmem [thread:$0]  %s15_s11, 128, %s17_s13, [#allocation3], %s199_s17, %s199_s17, %s200_s18  }
   0x6   :  { %s201_s19 = smov [#allocation5]  }
   0x7   :  { %s29_s20 = sshll.u32 %s201_s19, 4  ;;  %s30_s20 = int_to_ptr.vmem [resolvable:$true] %s29_s20 }
   0x8   :  { %35 = dma.hbm_to_vmem [thread:$0]  %s28_s16, 128, %s30_s20, [#allocation6], %s199_s17, %s199_s17, %s200_s18  }
   0x9   :  { %192 = dma.done.wait [#allocation3], 128  }
   0xa   :  { %193 = vsyncadd [#allocation3], 4294967168 }
   0xb   :  { %194 = dma.done.wait [#allocation6], 128  }
   0xc   :  { %195 = vsyncadd [#allocation6], 4294967168  ;;  %vm49_vm0 = vcmask 130048   ;;  %v47_v0 = vld [vmem:[#allocation5] sm:$0xf]  ;;  %s202_s0 = smov [#allocation7]  }
   0xd   :  { %v48_v1 = vld [vmem:[#allocation5 + $0x4] sm:$0xf]  ;;  %v54_v2 = vsel %vm49_vm0, %v47_v0, 0  ;;  %v45_v4 = vld [vmem:[#allocation2] sm:$0xf]  ;;  %s95_s1 = sshll.u32 %s202_s0, 4  ;;  %s96_s1 = int_to_ptr.vmem [resolvable:$true] %s95_s1 }
   0xe   :  { %v73_v3 = vsel %vm49_vm0, %v48_v1, 0  ;;  %63 = vmatpush.bf16.xpose.msra.mxu0 %v54_v2  ;;  %v46_v5 = vld [vmem:[#allocation2 + $0x4] sm:$0xf]  ;;  %s97_s23 = sshll.u32 %s231_s2, 4  ;;  %vm88_vm1 = vcmask 64512   ;;  %s203_s24 = smov 128   ;;  %s98_s23 = int_to_ptr.hbm [resolvable:$true] %s97_s23 }
   0xf   :  { %82 = vmatpush.bf16.xpose.msra.mxu1 %v73_v3  ;;  %s204_s25 = smov 8  }
  0x15   :  { %111 = vmatmul.msk.bf16.vlgmr.msra.gmra.mxu0 %vm49_vm0, %v45_v4 }
  0x16   :  { %112 = vmatmul.msk.bf16.vlgmr.msra.gmra.mxu1 %vm49_vm0, %v46_v5 }
  0x92   :  { %v65_v6 = vpop.f32.mrf.mxu0 }
  0x93   :  { %v84_v7 = vpop.f32.mrf.mxu1  ;;  %89 = vst.msk [vmem:[#allocation7] sm:$0xff] %vm88_vm1, %v65_v6 }
  0x94   :  { %90 = vst.msk [vmem:[#allocation7 + $0x8] sm:$0xff] %vm88_vm1, %v84_v7 }
  0x95   :  { %103 = dma.vmem_to_hbm [thread:$0]  %s96_s1, 256, %s98_s23, [#allocation4], %s203_s24, %s203_s24, %s204_s25  }
  0x9a   :  { %v67_v8 = vpop.f32.mrf.mxu0 }
  0x9b   :  { %v86_v9 = vpop.f32.mrf.mxu1 }
  0x9c   :  { %196 = dma.done.wait [#allocation4], 256  }
  0x9d   :  { %197 = vsyncadd [#allocation4], 4294967040 }
  0x9e   :  { %108 = vsyncpa [#allocation3], 1 }
  0x9f   :  { %109 = vsyncpa [#allocation6], 1 }
  0xa0   :  { %110 = vsyncpa [#allocation4], 1 }

</bundles_post_ra>
